<compile_context>
chip_gen: v7x
topology: tpu7x:2x2x1
jax: 0.10.0
libtpu: 0.0.40
codegen_flags: <defaults>
</compile_context>

<pallas_src>
import jax
import jax.numpy as jnp
from jax import lax
from jax.experimental import pallas as pl
from jax.experimental.pallas import tpu as pltpu


# ----------------------------------------------------------------------------- kernel
def _make_nrnn_block_kernel(t_total, tb, n, h, needs_mask):
    """Builds a kernel processing one time block of `tb` steps per grid point."""

    def kernel(x_ref, h0_ref,
               w1_ref, b1_ref,
               wih_ref, bgi_ref,
               whh_ref, bhn_ref,
               w2_ref, b2_ref,
               q_ref, hout_ref,
               gi_scr, hh_scr):
        blk = pl.program_id(0)
        wdt = w1_ref.dtype  # bf16 weight dtype

        @pl.when(blk == 0)
        def _():
            hout_ref[...] = h0_ref[...]

        # ---- hoisted, batched over the whole time block (off the serial path) ----
        x1 = jnp.dot(x_ref[...], w1_ref[...],
                     preferred_element_type=jnp.float32) + b1_ref[...]
        x1 = jnp.maximum(x1, 0.0)                                     # (Tb*N, H) f32
        gi_scr[...] = jnp.dot(x1.astype(wdt), wih_ref[...],
                              preferred_element_type=jnp.float32) + bgi_ref[...]

        # Hoist the bias broadcast out of the per-step loop (no CSE inside loops).
        b_hn = jnp.broadcast_to(bhn_ref[...], (n, h))                 # (N, H) f32

        # ---- serial GRU recurrence: only h @ W_hh + gate math per step ----
        def step(t, h_carry):
            row = pl.multiple_of(t * n, n)
            gi_t = gi_scr[pl.ds(row, n), :]                            # (N, 3H)
            gh = jnp.dot(h_carry.astype(wdt), whh_ref[...],
                         preferred_element_type=jnp.float32)           # (N, 3H)
            rz = jax.nn.sigmoid(gi_t[:, :2 * h] + gh[:, :2 * h])
            r = rz[:, :h]
            z = rz[:, h:]
            ng = jnp.tanh(gi_t[:, 2 * h:] + r * (gh[:, 2 * h:] + b_hn))
            h_new = (1.0 - z) * ng + z * h_carry
            if needs_mask:  # freeze the carry on padded tail steps
                h_new = jnp.where(blk * tb + t < t_total, h_new, h_carry)
            hh_scr[pl.ds(row, n), :] = h_new
            return h_new

        h_final = lax.fori_loop(0, tb, step, hout_ref[...], unroll=True)
        hout_ref[...] = h_final

        # ---- batched fc2 over the whole time block (lane-dense 128-wide tile) ----
        q = jnp.dot(hh_scr[...].astype(wdt), w2_ref[...],
                    preferred_element_type=jnp.float32) + b2_ref[...]
        q_ref[...] = q.astype(q_ref.dtype)

    return kernel


# ----------------------------------------------------------------------------- pallas wrapper
def _nrnn_pallas(x_seq, h0, p, time_block=8):
    """x_seq: (T, N, E) f32; h0: (N, H) f32; p: packed params (see pack_params)."""
    T, N, E = x_seq.shape
    H = h0.shape[-1]
    QP = p["w2"].shape[-1]
    wdt = p["w1"].dtype

    Tb = max(1, min(time_block, T))
    num_blocks = (T + Tb - 1) // Tb
    T_pad = num_blocks * Tb

    x_flat = x_seq.reshape(T * N, E).astype(wdt)       # bf16 streamed activations
    if T_pad != T:
        x_flat = jnp.pad(x_flat, ((0, (T_pad - T) * N), (0, 0)))

    kernel = _make_nrnn_block_kernel(T, Tb, N, H, needs_mask=(T_pad != T))

    q_flat, h_out = pl.pallas_call(
        kernel,
        grid=(num_blocks,),
        in_specs=[
            pl.BlockSpec((Tb * N, E), lambda i: (i, 0)),       # x: streamed per time block
            pl.BlockSpec((N, H), lambda i: (0, 0)),            # h0: resident
            pl.BlockSpec(p["w1"].shape, lambda i: (0, 0)),     # weights/biases: resident
            pl.BlockSpec(p["b1"].shape, lambda i: (0, 0)),
            pl.BlockSpec(p["w_ih"].shape, lambda i: (0, 0)),
            pl.BlockSpec(p["b_gi"].shape, lambda i: (0, 0)),
            pl.BlockSpec(p["w_hh"].shape, lambda i: (0, 0)),
            pl.BlockSpec(p["b_hn"].shape, lambda i: (0, 0)),
            pl.BlockSpec(p["w2"].shape, lambda i: (0, 0)),
            pl.BlockSpec(p["b2"].shape, lambda i: (0, 0)),
        ],
        out_specs=(
            pl.BlockSpec((Tb * N, QP), lambda i: (i, 0)),      # q per time block (lane-dense)
            pl.BlockSpec((N, H), lambda i: (0, 0)),            # h carry / final h
        ),
        out_shape=(
            jax.ShapeDtypeStruct((T_pad * N, QP), jnp.float32),
            jax.ShapeDtypeStruct((N, H), jnp.float32),
        ),
        scratch_shapes=[
            pltpu.VMEM((Tb * N, 3 * H), jnp.float32),   # gi for the whole block
            pltpu.VMEM((Tb * N, H), jnp.float32),       # h history for batched fc2
        ],
        compiler_params=pltpu.CompilerParams(
            dimension_semantics=("arbitrary",),                # sequential time carry
        ),
    )(x_flat, h0, p["w1"], p["b1"], p["w_ih"], p["b_gi"],
      p["w_hh"], p["b_hn"], p["w2"], p["b2"])

    q = q_flat.reshape(T_pad, N, QP)[:T]
    return q, h_out


def nrnn_agent_forward(inputs, hidden_state, packed, n_actions):
    """Single-step forward matching NRNNAgent.forward.

    inputs: (b, a, e) f32; hidden_state: (b, a, H) or (b*a, H)."""
    b, a, e = inputs.shape
    H = hidden_state.shape[-1]
    N = b * a
    q_seq, h_out = _nrnn_pallas(inputs.reshape(1, N, e),
                                hidden_state.reshape(N, H), packed)
    q = q_seq[0, :, :n_actions].reshape(b, a, n_actions)
    h = h_out.reshape(b, a, H)
    return q, h


def nrnn_agent_rollout(inputs_seq, hidden_state, packed, n_actions, time_block=8):
    """Multi-step rollout: time loop lives inside one pallas_call; weights resident."""
    T, b, a, e = inputs_seq.shape
    H = hidden_state.shape[-1]
    N = b * a
    q_seq, h_out = _nrnn_pallas(inputs_seq.reshape(T, N, e),
                                hidden_state.reshape(N, H), packed,
                                time_block=time_block)
    q = q_seq[:, :, :n_actions].reshape(T, b, a, n_actions)
    h = h_out.reshape(b, a, H)
    return q, h


# ----------------------------------------------------------------------------- params
def init_params(key, input_shape, rnn_hidden_dim, n_actions):
    """PyTorch-like uniform init; weights stored (in_features, out_features), f32.

    GRU gate order along the 3H axis is PyTorch's [r | z | n]."""
    ks = jax.random.split(key, 8)

    def unif(k, shape, fan_in):
        bound = 1.0 / jnp.sqrt(jnp.float32(fan_in))
        return jax.random.uniform(k, shape, jnp.float32, -bound, bound)

    E, Hd, A = input_shape, rnn_hidden_dim, n_actions
    return {
        "w1": unif(ks[0], (E, Hd), E),
        "b1": unif(ks[1], (1, Hd), E),
        "w_ih": unif(ks[2], (Hd, 3 * Hd), Hd),
        "b_ih": unif(ks[3], (1, 3 * Hd), Hd),
        "w_hh": unif(ks[4], (Hd, 3 * Hd), Hd),
        "b_hh": unif(ks[5], (1, 3 * Hd), Hd),
        "w2": unif(ks[6], (Hd, A), Hd),
        "b2": unif(ks[7], (1, A), Hd),
    }


def pack_params(params, weight_dtype=jnp.bfloat16):
    """Pack f32 reference params into the kernel layout:
       - split gi/gh GRU form: W_ih (H,3H), W_hh (H,3H), merged gate bias b_gi,
         separate hidden n-gate bias b_hn (must stay inside r * (.)),
       - bf16 weights, f32 biases,
       - fc2 zero-padded to a lane-dense 128-multiple width."""
    E, H = params["w1"].shape
    A = params["w2"].shape[1]
    QP = max(128, ((A + 127) // 128) * 128)

    b_ih, b_hh = params["b_ih"], params["b_hh"]        # (1, 3H) each, [r|z|n]
    b_gi = jnp.concatenate([b_ih[:, :2 * H] + b_hh[:, :2 * H],   # r,z biases folded
                            b_ih[:, 2 * H:]], axis=-1)           # n input bias
    b_hn = b_hh[:, 2 * H:]                                       # n hidden bias

    w2p = jnp.zeros((H, QP), jnp.float32).at[:, :A].set(params["w2"])
    b2p = jnp.zeros((1, QP), jnp.float32).at[:, :A].set(params["b2"])

    return {
        "w1": params["w1"].astype(weight_dtype),
        "b1": params["b1"],
        "w_ih": params["w_ih"].astype(weight_dtype),
        "b_gi": b_gi,
        "w_hh": params["w_hh"].astype(weight_dtype),
        "b_hn": b_hn,
        "w2": w2p.astype(weight_dtype),
        "b2": b2p,
    }


# ----------------------------------------------------------------------------- f32 reference
def reference_step(x, h, params):
    """Pure-JAX f32 single step mirroring the PyTorch module (flat (N, ...) layout)."""
    x1 = jnp.maximum(x @ params["w1"] + params["b1"], 0.0)
    gi = x1 @ params["w_ih"] + params["b_ih"]
    gh = h @ params["w_hh"] + params["b_hh"]
    i_r, i_z, i_n = jnp.split(gi, 3, axis=-1)
    h_r, h_z, h_n = jnp.split(gh, 3, axis=-1)
    r = jax.nn.sigmoid(i_r + h_r)
    z = jax.nn.sigmoid(i_z + h_z)
    n = jnp.tanh(i_n + r * h_n)
    h_new = (1.0 - z) * n + z * h
    q = h_new @ params["w2"] + params["b2"]
    return q, h_new


# ----------------------------------------------------------------------------- main
if __name__ == "__main__":
    batch, n_agents = 2, 4
    input_shape = 32
    rnn_hidden_dim = 128
    n_actions = 16
    T = 6

    key = jax.random.PRNGKey(0)
    k_in, k_h, k_seq, k_p = jax.random.split(key, 4)

    params = init_params(k_p, input_shape, rnn_hidden_dim, n_actions)
    packed = pack_params(params)

    inputs = jax.random.normal(k_in, (batch, n_agents, input_shape), jnp.float32)
    hidden = jax.random.normal(k_h, (batch, n_agents, rnn_hidden_dim), jnp.float32)

    # --- single step (matches NRNNAgent.forward) ---
    q, h = nrnn_agent_forward(inputs, hidden, packed, n_actions)
    jax.block_until_ready((q, h))

    q_ref, h_ref = reference_step(inputs.reshape(-1, input_shape),
                                  hidden.reshape(-1, rnn_hidden_dim), params)
    q_ref = q_ref.reshape(batch, n_agents, n_actions)
    h_ref = h_ref.reshape(batch, n_agents, rnn_hidden_dim)

    assert q.shape == (batch, n_agents, n_actions)
    assert h.shape == (batch, n_agents, rnn_hidden_dim)
    # bf16 weights/activations => compare against f32 reference with bf16 tolerance.
    assert jnp.allclose(q, q_ref, atol=3e-2, rtol=3e-2), float(jnp.max(jnp.abs(q - q_ref)))
    assert jnp.allclose(h, h_ref, atol=3e-2, rtol=3e-2), float(jnp.max(jnp.abs(h - h_ref)))

    # --- multi-step rollout (time blocked inside one pallas_call; T=6, Tb=4 ->
    #     2 grid steps with a padded / masked tail, exercising the carry logic) ---
    inputs_seq = jax.random.normal(k_seq, (T, batch, n_agents, input_shape), jnp.float32)
    q_seq, h_last = nrnn_agent_rollout(inputs_seq, hidden, packed, n_actions,
                                       time_block=4)
    jax.block_until_ready((q_seq, h_last))

    h_r = hidden.reshape(-1, rnn_hidden_dim)
    q_ref_steps = []
    for t in range(T):
        q_t, h_r = reference_step(inputs_seq[t].reshape(-1, input_shape), h_r, params)
        q_ref_steps.append(q_t)
    q_seq_ref = jnp.stack(q_ref_steps).reshape(T, batch, n_agents, n_actions)
    h_last_ref = h_r.reshape(batch, n_agents, rnn_hidden_dim)

    assert jnp.allclose(q_seq, q_seq_ref, atol=3e-2, rtol=3e-2), \
        float(jnp.max(jnp.abs(q_seq - q_seq_ref)))
    assert jnp.allclose(h_last, h_last_ref, atol=3e-2, rtol=3e-2), \
        float(jnp.max(jnp.abs(h_last - h_last_ref)))

    print("KERNEL_OK")
</pallas_src>

<mosaic_0001>
module attributes {stable_mosaic.version = 11 : i64} {
  func.func @kernel(%arg0: i32, %arg1: memref<8x32xbf16, #tpu.memory_space<vmem>>, %arg2: memref<8x128xf32, #tpu.memory_space<vmem>>, %arg3: memref<32x128xbf16, #tpu.memory_space<vmem>>, %arg4: memref<1x128xf32, #tpu.memory_space<vmem>>, %arg5: memref<128x384xbf16, #tpu.memory_space<vmem>>, %arg6: memref<1x384xf32, #tpu.memory_space<vmem>>, %arg7: memref<128x384xbf16, #tpu.memory_space<vmem>>, %arg8: memref<1x128xf32, #tpu.memory_space<vmem>>, %arg9: memref<128x128xbf16, #tpu.memory_space<vmem>>, %arg10: memref<1x128xf32, #tpu.memory_space<vmem>>, %arg11: memref<8x128xf32, #tpu.memory_space<vmem>>, %arg12: memref<8x128xf32, #tpu.memory_space<vmem>>, %arg13: memref<8x384xf32, #tpu.memory_space<vmem>>, %arg14: memref<8x128xf32, #tpu.memory_space<vmem>>) attributes {dimension_semantics = [#tpu.dimension_semantics<arbitrary>], iteration_bounds = array<i64: 1>, scalar_prefetch = 0 : i64, scratch_operands = 2 : i64, tpu.core_type = #tpu.core_type<tc>, window_params = [{transform_indices = @transform_0, window_bounds = array<i64: 8, 32>}, {pipeline_mode = #tpu.pipeline_mode<synchronous>, transform_indices = @transform_1, window_bounds = array<i64: 8, 128>}, {pipeline_mode = #tpu.pipeline_mode<synchronous>, transform_indices = @transform_2, window_bounds = array<i64: 32, 128>}, {pipeline_mode = #tpu.pipeline_mode<synchronous>, transform_indices = @transform_3, window_bounds = array<i64: 1, 128>}, {pipeline_mode = #tpu.pipeline_mode<synchronous>, transform_indices = @transform_4, window_bounds = array<i64: 128, 384>}, {pipeline_mode = #tpu.pipeline_mode<synchronous>, transform_indices = @transform_5, window_bounds = array<i64: 1, 384>}, {pipeline_mode = #tpu.pipeline_mode<synchronous>, transform_indices = @transform_6, window_bounds = array<i64: 128, 384>}, {pipeline_mode = #tpu.pipeline_mode<synchronous>, transform_indices = @transform_7, window_bounds = array<i64: 1, 128>}, {pipeline_mode = #tpu.pipeline_mode<synchronous>, transform_indices = @transform_8, window_bounds = array<i64: 128, 128>}, {pipeline_mode = #tpu.pipeline_mode<synchronous>, transform_indices = @transform_9, window_bounds = array<i64: 1, 128>}, {transform_indices = @transform_10, window_bounds = array<i64: 8, 128>}, {pipeline_mode = #tpu.pipeline_mode<synchronous>, transform_indices = @transform_11, window_bounds = array<i64: 8, 128>}]} {
    %c0_i32 = arith.constant 0 : i32
    %0 = arith.cmpi eq, %arg0, %c0_i32 : i32
    %1 = arith.extui %0 : i1 to i32
    %c0_i32_0 = arith.constant 0 : i32
    %2 = arith.cmpi ne, %1, %c0_i32_0 : i32
    scf.if %2 {
      %c0_37 = arith.constant 0 : index
      %c0_38 = arith.constant 0 : index
      %61 = vector.load %arg2[%c0_37, %c0_38] : memref<8x128xf32, #tpu.memory_space<vmem>>, vector<8x128xf32>
      %c0_39 = arith.constant 0 : index
      %c0_40 = arith.constant 0 : index
      %62 = vector.load %arg12[%c0_39, %c0_40] : memref<8x128xf32, #tpu.memory_space<vmem>>, vector<8x128xf32>
      tpu.vector_store %arg12[%c0_39, %c0_40], %61 {strides = array<i32>} : memref<8x128xf32, #tpu.memory_space<vmem>>, vector<8x128xf32>,
    } else {
    }
    %c0 = arith.constant 0 : index
    %c0_1 = arith.constant 0 : index
    %3 = vector.load %arg1[%c0, %c0_1] : memref<8x32xbf16, #tpu.memory_space<vmem>>, vector<8x32xbf16>
    %c0_2 = arith.constant 0 : index
    %c0_3 = arith.constant 0 : index
    %4 = vector.load %arg3[%c0_2, %c0_3] : memref<32x128xbf16, #tpu.memory_space<vmem>>, vector<32x128xbf16>
    %cst = arith.constant dense<0.000000e+00> : vector<8x128xf32>
    %5 = tpu.matmul %3, %4, %cst {dimension_numbers = #tpu.dot_dimension_numbers<[1], [0], [0], [1], [0, 0, 1, 1], [], []>} : vector<8x32xbf16>, vector<32x128xbf16>, vector<8x128xf32> -> vector<8x128xf32>
    %c0_4 = arith.constant 0 : index
    %c0_5 = arith.constant 0 : index
    %6 = vector.load %arg4[%c0_4, %c0_5] : memref<1x128xf32, #tpu.memory_space<vmem>>, vector<1x128xf32>
    %7 = vector.broadcast %6 : vector<1x128xf32> to vector<8x128xf32>
    %8 = arith.addf %5, %7 : vector<8x128xf32>
    %cst_6 = arith.constant 0.000000e+00 : f32
    %9 = vector.broadcast %cst_6 : f32 to vector<8x128xf32>
    %10 = arith.maximumf %8, %9 : vector<8x128xf32>
    %11 = arith.truncf %10 : vector<8x128xf32> to vector<8x128xbf16>
    %c0_7 = arith.constant 0 : index
    %c0_8 = arith.constant 0 : index
    %12 = vector.load %arg5[%c0_7, %c0_8] : memref<128x384xbf16, #tpu.memory_space<vmem>>, vector<128x384xbf16>
    %cst_9 = arith.constant dense<0.000000e+00> : vector<8x384xf32>
    %13 = tpu.matmul %11, %12, %cst_9 {dimension_numbers = #tpu.dot_dimension_numbers<[1], [0], [0], [1], [0, 0, 1, 1], [], []>} : vector<8x128xbf16>, vector<128x384xbf16>, vector<8x384xf32> -> vector<8x384xf32>
    %c0_10 = arith.constant 0 : index
    %c0_11 = arith.constant 0 : index
    %14 = vector.load %arg6[%c0_10, %c0_11] : memref<1x384xf32, #tpu.memory_space<vmem>>, vector<1x384xf32>
    %15 = vector.broadcast %14 : vector<1x384xf32> to vector<8x384xf32>
    %16 = arith.addf %13, %15 : vector<8x384xf32>
    %c0_12 = arith.constant 0 : index
    %c0_13 = arith.constant 0 : index
    %17 = vector.load %arg13[%c0_12, %c0_13] : memref<8x384xf32, #tpu.memory_space<vmem>>, vector<8x384xf32>
    tpu.vector_store %arg13[%c0_12, %c0_13], %16 {strides = array<i32>} : memref<8x384xf32, #tpu.memory_space<vmem>>, vector<8x384xf32>,
    %c0_14 = arith.constant 0 : index
    %c0_15 = arith.constant 0 : index
    %18 = vector.load %arg8[%c0_14, %c0_15] : memref<1x128xf32, #tpu.memory_space<vmem>>, vector<1x128xf32>
    %19 = vector.shape_cast %18 : vector<1x128xf32> to vector<1x128xf32>
    %20 = vector.broadcast %19 : vector<1x128xf32> to vector<8x128xf32>
    %c0_16 = arith.constant 0 : index
    %c0_17 = arith.constant 0 : index
    %21 = vector.load %arg12[%c0_16, %c0_17] : memref<8x128xf32, #tpu.memory_space<vmem>>, vector<8x128xf32>
    %c0_i32_18 = arith.constant 0 : i32
    %c8_i32 = arith.constant 8 : i32
    %22 = arith.muli %c0_i32_18, %c8_i32 : i32
    %23 = tpu.assume_multiple %22, 8 : i32
    %24 = arith.index_cast %23 : i32 to index
    %c0_19 = arith.constant 0 : index
    %25 = vector.load %arg13[%24, %c0_19] : memref<8x384xf32, #tpu.memory_space<vmem>>, vector<8x384xf32>
    %26 = arith.truncf %21 : vector<8x128xf32> to vector<8x128xbf16>
    %c0_20 = arith.constant 0 : index
    %c0_21 = arith.constant 0 : index
    %27 = vector.load %arg7[%c0_20, %c0_21] : memref<128x384xbf16, #tpu.memory_space<vmem>>, vector<128x384xbf16>
    %cst_22 = arith.constant dense<0.000000e+00> : vector<8x384xf32>
    %28 = tpu.matmul %26, %27, %cst_22 {dimension_numbers = #tpu.dot_dimension_numbers<[1], [0], [0], [1], [0, 0, 1, 1], [], []>} : vector<8x128xbf16>, vector<128x384xbf16>, vector<8x384xf32> -> vector<8x384xf32>
    %29 = vector.extract_strided_slice %25 {offsets = [0, 0], sizes = [8, 256], strides = [1, 1]} : vector<8x384xf32> to vector<8x256xf32>
    %30 = vector.extract_strided_slice %28 {offsets = [0, 0], sizes = [8, 256], strides = [1, 1]} : vector<8x384xf32> to vector<8x256xf32>
    %31 = arith.addf %29, %30 : vector<8x256xf32>
    %32 = arith.negf %31 : vector<8x256xf32>
    %33 = math.exp %32 : vector<8x256xf32>
    %cst_23 = arith.constant 1.000000e+00 : f32
    %34 = vector.broadcast %cst_23 : f32 to vector<8x256xf32>
    %35 = arith.addf %34, %33 : vector<8x256xf32>
    %36 = arith.divf %34, %35 : vector<8x256xf32>
    %37 = vector.extract_strided_slice %36 {offsets = [0, 0], sizes = [8, 128], strides = [1, 1]} : vector<8x256xf32> to vector<8x128xf32>
    %38 = vector.extract_strided_slice %36 {offsets = [0, 128], sizes = [8, 128], strides = [1, 1]} : vector<8x256xf32> to vector<8x128xf32>
    %39 = vector.extract_strided_slice %25 {offsets = [0, 256], sizes = [8, 128], strides = [1, 1]} : vector<8x384xf32> to vector<8x128xf32>
    %40 = vector.extract_strided_slice %28 {offsets = [0, 256], sizes = [8, 128], strides = [1, 1]} : vector<8x384xf32> to vector<8x128xf32>
    %41 = arith.addf %40, %20 : vector<8x128xf32>
    %42 = arith.mulf %37, %41 : vector<8x128xf32>
    %43 = arith.addf %39, %42 : vector<8x128xf32>
    %44 = math.tanh %43 : vector<8x128xf32>
    %cst_24 = arith.constant 1.000000e+00 : f32
    %45 = vector.broadcast %cst_24 : f32 to vector<8x128xf32>
    %46 = arith.subf %45, %38 : vector<8x128xf32>
    %47 = arith.mulf %46, %44 : vector<8x128xf32>
    %48 = arith.mulf %38, %21 : vector<8x128xf32>
    %49 = arith.addf %47, %48 : vector<8x128xf32>
    %50 = arith.index_cast %23 : i32 to index
    %c0_25 = arith.constant 0 : index
    %51 = vector.load %arg14[%50, %c0_25] : memref<8x128xf32, #tpu.memory_space<vmem>>, vector<8x128xf32>
    tpu.vector_store %arg14[%50, %c0_25], %49 {strides = array<i32>} : memref<8x128xf32, #tpu.memory_space<vmem>>, vector<8x128xf32>,
    %c1_i32 = arith.constant 1 : i32
    %c0_26 = arith.constant 0 : index
    %c0_27 = arith.constant 0 : index
    %52 = vector.load %arg12[%c0_26, %c0_27] : memref<8x128xf32, #tpu.memory_space<vmem>>, vector<8x128xf32>
    tpu.vector_store %arg12[%c0_26, %c0_27], %49 {strides = array<i32>} : memref<8x128xf32, #tpu.memory_space<vmem>>, vector<8x128xf32>,
    %c0_28 = arith.constant 0 : index
    %c0_29 = arith.constant 0 : index
    %53 = vector.load %arg14[%c0_28, %c0_29] : memref<8x128xf32, #tpu.memory_space<vmem>>, vector<8x128xf32>
    %54 = arith.truncf %53 : vector<8x128xf32> to vector<8x128xbf16>
    %c0_30 = arith.constant 0 : index
    %c0_31 = arith.constant 0 : index
    %55 = vector.load %arg9[%c0_30, %c0_31] : memref<128x128xbf16, #tpu.memory_space<vmem>>, vector<128x128xbf16>
    %cst_32 = arith.constant dense<0.000000e+00> : vector<8x128xf32>
    %56 = tpu.matmul %54, %55, %cst_32 {dimension_numbers = #tpu.dot_dimension_numbers<[1], [0], [0], [1], [0, 0, 1, 1], [], []>} : vector<8x128xbf16>, vector<128x128xbf16>, vector<8x128xf32> -> vector<8x128xf32>
    %c0_33 = arith.constant 0 : index
    %c0_34 = arith.constant 0 : index
    %57 = vector.load %arg10[%c0_33, %c0_34] : memref<1x128xf32, #tpu.memory_space<vmem>>, vector<1x128xf32>
    %58 = vector.broadcast %57 : vector<1x128xf32> to vector<8x128xf32>
    %59 = arith.addf %56, %58 : vector<8x128xf32>
    %c0_35 = arith.constant 0 : index
    %c0_36 = arith.constant 0 : index
    %60 = vector.load %arg11[%c0_35, %c0_36] : memref<8x128xf32, #tpu.memory_space<vmem>>, vector<8x128xf32>
    tpu.vector_store %arg11[%c0_35, %c0_36], %59 {strides = array<i32>} : memref<8x128xf32, #tpu.memory_space<vmem>>, vector<8x128xf32>,
    return
  }
  func.func @transform_0(%arg0: i32) -> (i32, i32) {
    %c0_i32 = arith.constant 0 : i32
    %c0_i32_0 = arith.constant 0 : i32
    return %arg0, %c0_i32 : i32, i32
  }
  func.func @transform_1(%arg0: i32) -> (i32, i32) {
    %c0_i32 = arith.constant 0 : i32
    %c0_i32_0 = arith.constant 0 : i32
    %c0_i32_1 = arith.constant 0 : i32
    return %c0_i32, %c0_i32_0 : i32, i32
  }
  func.func @transform_2(%arg0: i32) -> (i32, i32) {
    %c0_i32 = arith.constant 0 : i32
    %c0_i32_0 = arith.constant 0 : i32
    %c0_i32_1 = arith.constant 0 : i32
    return %c0_i32, %c0_i32_0 : i32, i32
  }
  func.func @transform_3(%arg0: i32) -> (i32, i32) {
    %c0_i32 = arith.constant 0 : i32
    %c0_i32_0 = arith.constant 0 : i32
    %c0_i32_1 = arith.constant 0 : i32
    return %c0_i32, %c0_i32_0 : i32, i32
  }
  func.func @transform_4(%arg0: i32) -> (i32, i32) {
    %c0_i32 = arith.constant 0 : i32
    %c0_i32_0 = arith.constant 0 : i32
    %c0_i32_1 = arith.constant 0 : i32
    return %c0_i32, %c0_i32_0 : i32, i32
  }
  func.func @transform_5(%arg0: i32) -> (i32, i32) {
    %c0_i32 = arith.constant 0 : i32
    %c0_i32_0 = arith.constant 0 : i32
    %c0_i32_1 = arith.constant 0 : i32
    return %c0_i32, %c0_i32_0 : i32, i32
  }
  func.func @transform_6(%arg0: i32) -> (i32, i32) {
    %c0_i32 = arith.constant 0 : i32
    %c0_i32_0 = arith.constant 0 : i32
    %c0_i32_1 = arith.constant 0 : i32
    return %c0_i32, %c0_i32_0 : i32, i32
  }
  func.func @transform_7(%arg0: i32) -> (i32, i32) {
    %c0_i32 = arith.constant 0 : i32
    %c0_i32_0 = arith.constant 0 : i32
    %c0_i32_1 = arith.constant 0 : i32
    return %c0_i32, %c0_i32_0 : i32, i32
  }
  func.func @transform_8(%arg0: i32) -> (i32, i32) {
    %c0_i32 = arith.constant 0 : i32
    %c0_i32_0 = arith.constant 0 : i32
    %c0_i32_1 = arith.constant 0 : i32
    return %c0_i32, %c0_i32_0 : i32, i32
  }
  func.func @transform_9(%arg0: i32) -> (i32, i32) {
    %c0_i32 = arith.constant 0 : i32
    %c0_i32_0 = arith.constant 0 : i32
    %c0_i32_1 = arith.constant 0 : i32
    return %c0_i32, %c0_i32_0 : i32, i32
  }
  func.func @transform_10(%arg0: i32) -> (i32, i32) {
    %c0_i32 = arith.constant 0 : i32
    %c0_i32_0 = arith.constant 0 : i32
    return %arg0, %c0_i32 : i32, i32
  }
  func.func @transform_11(%arg0: i32) -> (i32, i32) {
    %c0_i32 = arith.constant 0 : i32
    %c0_i32_0 = arith.constant 0 : i32
    %c0_i32_1 = arith.constant 0 : i32
    return %c0_i32, %c0_i32_0 : i32, i32
  }
}

</mosaic_0001>

<bundles_post_ra>
// kernel: tpu_custom_call.1
= control target key start
LH: loop header
LB: loop body
LE: loop exit
PB: predicated region body
PF: predicated region fallthrough
CT: control target
= control target key end

     0   :  { %17 = vsyncpa [#allocation5], 0  ;;  %s1591_s0 = inlined_call_operand.hbm [shape: bf16[8,32], index: 0, kind: input, shape index: {}]   ;;  %s1592_s1 = inlined_call_operand.hbm [shape: f32[8,128], index: 1, kind: input, shape index: {}]   ;;  %s1593_s2 = inlined_call_operand.hbm [shape: bf16[32,128], index: 2, kind: input, shape index: {}]   ;;  %s1594_s3 = inlined_call_operand.vmem [shape: f32[1,128], index: 3, kind: input, shape index: {}]   ;;  %s1595_s4 = inlined_call_operand.hbm [shape: bf16[128,384], index: 4, kind: input, shape index: {}]   ;;  %s1596_s5 = inlined_call_operand.vmem [shape: f32[1,384], index: 5, kind: input, shape index: {}]   ;;  %s1597_s6 = inlined_call_operand.hbm [shape: bf16[128,384], index: 6, kind: input, shape index: {}]   ;;  %s1598_s7 = inlined_call_operand.vmem [shape: f32[1,128], index: 7, kind: input, shape index: {}]   ;;  %s1599_s8 = inlined_call_operand.hbm [shape: bf16[128,128], index: 8, kind: input, shape index: {}]   ;;  %s1600_s9 = inlined_call_operand.vmem [shape: f32[1,128], index: 9, kind: input, shape index: {}]   ;;  %s1601_s10 = inlined_call_operand.hbm [shape: f32[8,128], index: 10, kind: output, shape index: {0}]   ;;  %s1602_s11 = inlined_call_operand.hbm [shape: f32[8,128], index: 11, kind: output, shape index: {1}]  }
   0x1   :  { %18 = vsyncpa [#allocation8], 0 }
   0x2   :  { %19 = vsyncpa [#allocation11], 0 }
   0x3   :  { %20 = vsyncpa [#allocation14], 0 }
   0x4   :  { %21 = vsyncpa [#allocation6], 0 }
   0x5   :  { %22 = vsyncpa [#allocation17], 0  ;;  %s1336_s17 = smov [#allocation7]   ;;  %s1337_s19 = smov [#allocation10]  }
   0x6   :  { %s39_s18 = sshll.u32 %s1336_s17, 4  ;;  %s62_s20 = sshll.u32 %s1337_s19, 4  ;;  %s40_s18 = int_to_ptr.vmem [resolvable:$true] %s39_s18  ;;  %s1411_s20 = int_to_ptr.vmem [resolvable:$true] %s62_s20 }
   0x7   :  { %s1148_s23 = scalar_lea.hbm %s1592_s1, 128 }
   0x8   :  { %p1149_p0 = scmp.ne.s32.totalorder %s1592_s1, %s1148_s23  ;;  %p1152_p1 = scmp.lt.u32.totalorder %s1148_s23, %s1592_s1 }
   0xa   :  { %p1154_p2 = pnand %p1152_p1, %p1149_p0 }
   0xc   :  { %1157 = shalt.err (!%p1154_p2)
}
   0xd   :  { %s1158_s28 = scalar_lea.vmem %s40_s18, 128  ;;  %p1163_p4 = scmp.lt.s32.totalorder %s40_s18, %s40_s18 }
   0xe   :  { %p1159_p3 = scmp.ne.s32.totalorder %s40_s18, %s1158_s28  ;;  %p1164_p5 = scmp.lt.s32.totalorder %s1158_s28, %s1158_s28 }
  0x10   :  { %p1165_p6 = por %p1164_p5, %p1163_p4 }
  0x12   :  { %p1166_p7 = pnand %p1165_p6, %p1159_p3 }
  0x14   :  { %1169 = shalt.err (!%p1166_p7)
}
  0x15   :  { %42 = dma.hbm_to_vmem [thread:$0]  %s1592_s1, 128, %s40_s18, [#allocation8]  }
  0x16   :  { %s1170_s14 = scalar_lea.hbm %s1595_s4, 3072 }
  0x17   :  { %p1171_p8 = scmp.ne.s32.totalorder %s1595_s4, %s1170_s14  ;;  %p1174_p9 = scmp.lt.u32.totalorder %s1170_s14, %s1595_s4 }
  0x19   :  { %p1176_p10 = pnand %p1174_p9, %p1171_p8 }
  0x1b   :  { %1179 = shalt.err (!%p1176_p10)
}
  0x1c   :  { %s1180_s21 = scalar_lea.vmem %s1411_s20, 3072  ;;  %p1185_p12 = scmp.lt.s32.totalorder %s1411_s20, %s1411_s20 }
  0x1d   :  { %p1181_p11 = scmp.ne.s32.totalorder %s1411_s20, %s1180_s21  ;;  %p1186_p13 = scmp.lt.s32.totalorder %s1180_s21, %s1180_s21 }
  0x1f   :  { %p1187_p0 = por %p1186_p13, %p1185_p12 }
  0x21   :  { %p1188_p1 = pnand %p1187_p0, %p1181_p11 }
  0x23   :  { %1191 = shalt.err (!%p1188_p1)
}
  0x24   :  { %s1338_s1 = smov 192   ;;  %s1339_s18 = smov 12  }
  0x25   :  { %68 = dma.hbm_to_vmem [thread:$0]  %s1595_s4, 3072, %s1411_s20, [#allocation11], %s1338_s1, %s1338_s1, %s1339_s18  }
  0x26   :  { %s1340_s24 = smov [#allocation4]   ;;  %s1341_s26 = smov [#allocation9]  }
  0x27   :  { %s29_s25 = sshll.u32 %s1340_s24, 4  ;;  %s48_s27 = sshll.u32 %s1341_s26, 4  ;;  %s30_s25 = int_to_ptr.vmem [resolvable:$true] %s29_s25  ;;  %s1445_s27 = int_to_ptr.vmem [resolvable:$true] %s48_s27 }
  0x28   :  { %s1192_s30 = scalar_lea.hbm %s1591_s0, 64 }
  0x29   :  { %p1193_p2 = scmp.ne.s32.totalorder %s1591_s0, %s1192_s30  ;;  %p1196_p3 = scmp.lt.u32.totalorder %s1192_s30, %s1591_s0 }
  0x2b   :  { %p1198_p4 = pnand %p1196_p3, %p1193_p2 }
  0x2d   :  { %1201 = shalt.err (!%p1198_p4)
}
  0x2e   :  { %s1202_s4 = scalar_lea.vmem %s30_s25, 64  ;;  %p1207_p6 = scmp.lt.s32.totalorder %s30_s25, %s30_s25 }
  0x2f   :  { %p1203_p5 = scmp.ne.s32.totalorder %s30_s25, %s1202_s4  ;;  %p1208_p7 = scmp.lt.s32.totalorder %s1202_s4, %s1202_s4 }
  0x31   :  { %p1209_p8 = por %p1208_p7, %p1207_p6 }
  0x33   :  { %p1210_p9 = pnand %p1209_p8, %p1203_p5 }
  0x35   :  { %1213 = shalt.err (!%p1210_p9)
}
  0x36   :  { %32 = dma.hbm_to_vmem [thread:$0]  %s1591_s0, 64, %s30_s25, [#allocation5]  }
  0x37   :  { %s1214_s21 = scalar_lea.hbm %s1593_s2, 256 }
  0x38   :  { %p1215_p10 = scmp.ne.s32.totalorder %s1593_s2, %s1214_s21  ;;  %p1218_p11 = scmp.lt.u32.totalorder %s1214_s21, %s1593_s2 }
  0x3a   :  { %p1220_p12 = pnand %p1218_p11, %p1215_p10 }
  0x3c   :  { %1223 = shalt.err (!%p1220_p12)
}
  0x3d   :  { %s1224_s28 = scalar_lea.vmem %s1445_s27, 256  ;;  %p1229_p0 = scmp.lt.s32.totalorder %s1445_s27, %s1445_s27 }
  0x3e   :  { %p1225_p13 = scmp.ne.s32.totalorder %s1445_s27, %s1224_s28  ;;  %p1230_p1 = scmp.lt.s32.totalorder %s1224_s28, %s1224_s28 }
  0x40   :  { %p1231_p2 = por %p1230_p1, %p1229_p0 }
  0x42   :  { %p1232_p3 = pnand %p1231_p2, %p1225_p13 }
  0x44   :  { %1235 = shalt.err (!%p1232_p3)
}
  0x45   :  { %s1342_s0 = smov 64   ;;  %s1343_s25 = smov 4  }
  0x46   :  { %54 = dma.hbm_to_vmem [thread:$0]  %s1593_s2, 256, %s1445_s27, [#allocation8], %s1342_s0, %s1342_s0, %s1343_s25  }
  0x47   :  { %s1344_s12 = smov [#allocation12]   ;;  %s1345_s14 = smov [#allocation13]  }
  0x48   :  { %s76_s13 = sshll.u32 %s1344_s12, 4  ;;  %s90_s15 = sshll.u32 %s1345_s14, 4  ;;  %s77_s13 = int_to_ptr.vmem [resolvable:$true] %s76_s13  ;;  %s1479_s15 = int_to_ptr.vmem [resolvable:$true] %s90_s15 }
  0x49   :  { %s1236_s16 = scalar_lea.hbm %s1597_s6, 3072 }
  0x4a   :  { %p1237_p4 = scmp.ne.s32.totalorder %s1597_s6, %s1236_s16  ;;  %p1240_p5 = scmp.lt.u32.totalorder %s1236_s16, %s1597_s6 }
  0x4c   :  { %p1242_p6 = pnand %p1240_p5, %p1237_p4 }
  0x4e   :  { %1245 = shalt.err (!%p1242_p6)
}
  0x4f   :  { %s1246_s2 = scalar_lea.vmem %s77_s13, 3072  ;;  %p1251_p8 = scmp.lt.s32.totalorder %s77_s13, %s77_s13 }
  0x50   :  { %p1247_p7 = scmp.ne.s32.totalorder %s77_s13, %s1246_s2  ;;  %p1252_p9 = scmp.lt.s32.totalorder %s1246_s2, %s1246_s2 }
  0x52   :  { %p1253_p10 = por %p1252_p9, %p1251_p8 }
  0x54   :  { %p1254_p11 = pnand %p1253_p10, %p1247_p7 }
  0x56   :  { %1257 = shalt.err (!%p1254_p11)
}
  0x57   :  { %82 = dma.hbm_to_vmem [thread:$0]  %s1597_s6, 3072, %s77_s13, [#allocation11], %s1338_s1, %s1338_s1, %s1339_s18  }
  0x58   :  { %s1258_s28 = scalar_lea.hbm %s1599_s8, 1024 }
  0x59   :  { %p1259_p12 = scmp.ne.s32.totalorder %s1599_s8, %s1258_s28  ;;  %p1262_p13 = scmp.lt.u32.totalorder %s1258_s28, %s1599_s8 }
  0x5b   :  { %p1264_p0 = pnand %p1262_p13, %p1259_p12 }
  0x5d   :  { %1267 = shalt.err (!%p1264_p0)
}
  0x5e   :  { %s1268_s4 = scalar_lea.vmem %s1479_s15, 1024  ;;  %p1273_p2 = scmp.lt.s32.totalorder %s1479_s15, %s1479_s15 }
  0x5f   :  { %p1269_p1 = scmp.ne.s32.totalorder %s1479_s15, %s1268_s4  ;;  %p1274_p3 = scmp.lt.s32.totalorder %s1268_s4, %s1268_s4 }
  0x61   :  { %p1275_p4 = por %p1274_p3, %p1273_p2 }
  0x63   :  { %p1276_p5 = pnand %p1275_p4, %p1269_p1 }
  0x65   :  { %1279 = shalt.err (!%p1276_p5)
}
  0x66   :  { %96 = dma.hbm_to_vmem [thread:$0]  %s1599_s8, 1024, %s1479_s15, [#allocation14], %s1342_s0, %s1342_s0, %s1343_s25  }
  0x67   :  { %1324 = dma.done.wait [#allocation5], 64  }
  0x68   :  { %1325 = vsyncadd [#allocation5], 4294967232 }
  0x69   :  { %1326 = dma.done.wait [#allocation8], 384  }
  0x6a   :  { %1327 = vsyncadd [#allocation8], 4294966912 }
  0x6b   :  { %1328 = dma.done.wait [#allocation11], 6144  }
  0x6c   :  { %1329 = vsyncadd [#allocation11], 4294961152 }
  0x6d   :  { %1330 = dma.done.wait [#allocation14], 1024  }
  0x6e   :  { %1331 = vsyncadd [#allocation14], 4294966272  ;;  %v1346_v0 = vmov 0.0   ;;  %vm1347_vm0 = vmmov 0   ;;  %v1064_v1 = vld [vmem:[#allocation9] sm:$0xff]   ;;  %v1065_v2 = vld [vmem:[#allocation9 + $0x8] sm:$0xff]  }
  0x6f   :  { %975 = vmatprep.subr.bf16.mxu0 %v1346_v0  ;;  %979 = vmatprep.mubr.msk.bf16.mxu0 %vm1347_vm0, %v1346_v0  ;;  %v1066_v3 = vld [vmem:[#allocation10 + $0x4] ss:$12 sps:$4 sm:$0xff]   ;;  %v1068_v4 = vld [vmem:[#allocation10] ss:$12 sps:$4 sm:$0xff]   ;;  %vm148_vm1 = vcmask 261120   ;;  %v1348_v29 = vmov 0  }
  0x70   :  { %976 = vmatpush3.bf16.msra.mxu0 %v1064_v1  ;;  %v124_v5 = vld [vmem:[#allocation4] sm:$0xf]  ;;  %371 = vmatprep.subr.bf16.mxu1 %v1066_v3  ;;  %v1069_v6 = vld [vmem:[#allocation10 + $0x8] ss:$12 sps:$4 sm:$0xff]   ;;  %v1073_v10 = vld [vmem:[#allocation10 + $0x20] ss:$12 sps:$4 sm:$0xff]  }
  0x71   :  { %977 = vmatprep.subr.bf16.mxu0 %v1346_v0  ;;  %v1070_v7 = vld [vmem:[#allocation10 + $0x1c] ss:$12 sps:$4 sm:$0xff]   ;;  %372 = vmatpush1.bf16.msra.mxu1 %v1068_v4  ;;  %v1072_v8 = vld [vmem:[#allocation10 + $0x18] ss:$12 sps:$4 sm:$0xff]   ;;  %v1074_v9 = vld [vmem:[#allocation10 + $0x34] ss:$12 sps:$4 sm:$0xff]  }
  0x72   :  { %373 = vmatprep.subr.bf16.mxu1 %v1070_v7  ;;  %v1076_v11 = vld [vmem:[#allocation10 + $0x30] ss:$12 sps:$4 sm:$0xff]   ;;  %v1078_v12 = vld [vmem:[#allocation10 + $0x4c] ss:$12 sps:$4 sm:$0xff]   ;;  %v1080_v14 = vld [vmem:[#allocation10 + $0x48] ss:$12 sps:$4 sm:$0xff]   ;;  %403 = vmatprep.mubr.bf16.mxu1 %v1348_v29 }
  0x73   :  { %v1077_v13 = vld [vmem:[#allocation10 + $0x38] ss:$12 sps:$4 sm:$0xff]   ;;  %v1081_v16 = vld [vmem:[#allocation10 + $0x50] ss:$12 sps:$4 sm:$0xff]   ;;  %v1084_v17 = vld [vmem:[#allocation10 + $0x60] ss:$12 sps:$4 sm:$0xff]  }
  0x74   :  { %978 = vmatpush3.bf16.msra.mxu0 %v1065_v2  ;;  %v1082_v15 = vld [vmem:[#allocation10 + $0x64] ss:$12 sps:$4 sm:$0xff]   ;;  %v1086_v18 = vld [vmem:[#allocation10 + $0x7c] ss:$12 sps:$4 sm:$0xff]   ;;  %v1090_v21 = vld [vmem:[#allocation10 + $0x94] ss:$12 sps:$4 sm:$0xff]  }
  0x75   :  { %983 = vmatprep.subr.bf16.mxu0 %v1346_v0  ;;  %374 = vmatpush1.bf16.msra.mxu1 %v1072_v8  ;;  %v1085_v19 = vld [vmem:[#allocation10 + $0x68] ss:$12 sps:$4 sm:$0xff]   ;;  %v1088_v20 = vld [vmem:[#allocation10 + $0x78] ss:$12 sps:$4 sm:$0xff]   ;;  %v1089_v22 = vld [vmem:[#allocation10 + $0x80] ss:$12 sps:$4 sm:$0xff]  }
  0x76   :  { %375 = vmatprep.subr.bf16.mxu1 %v1074_v9  ;;  %v1092_v23 = vld [vmem:[#allocation10 + $0x90] ss:$12 sps:$4 sm:$0xff]   ;;  %v1093_v24 = vld [vmem:[#allocation10 + $0x98] ss:$12 sps:$4 sm:$0xff]   ;;  %v1096_v26 = vld [vmem:[#allocation10 + $0xa8] ss:$12 sps:$4 sm:$0xff]  }
  0x77   :  { %980 = vmatmul.mubr.msk.bf16.vlgmr.msra.gmra.mrb[0].mxu0 %vm148_vm1, %v124_v5  ;;  %v1094_v25 = vld [vmem:[#allocation10 + $0xac] ss:$12 sps:$4 sm:$0xff]   ;;  %v1097_v27 = vld [vmem:[#allocation10 + $0xb0] ss:$12 sps:$4 sm:$0xff]   ;;  %v881_v30 = vld [vmem:[%s1594_s3] ss:$0 sm:$0xff] }
  0x78   :  { %984 = vmatpush3.bf16.msra.mxu0 %v1069_v6  ;;  %999 = vmatprep.mubr.msk.bf16.mxu0 %vm1347_vm0, %v1346_v0  ;;  %v1100_v28 = vld [vmem:[#allocation12 + $0x4] ss:$12 sps:$4 sm:$0xff]   ;;  %v1098_v37 = vld [vmem:[#allocation12] ss:$12 sps:$4 sm:$0xff]   ;;  %v1119_v38 = vld [vmem:[#allocation12 + $0x8] ss:$12 sps:$4 sm:$0xff]  }
  0x79   :  { %985 = vmatprep.subr.bf16.mxu0 %v1346_v0  ;;  %376 = vmatpush1.bf16.msra.mxu1 %v1076_v11  ;;  %v1103_v40 = vld [vmem:[#allocation12 + $0x1c] ss:$12 sps:$4 sm:$0xff]   ;;  %v1101_v41 = vld [vmem:[#allocation12 + $0x18] ss:$12 sps:$4 sm:$0xff]   ;;  %v1123_v42 = vld [vmem:[#allocation12 + $0x20] ss:$12 sps:$4 sm:$0xff]  }
  0x7a   :  { %377 = vmatprep.subr.bf16.mxu1 %v1078_v12  ;;  %v1106_v43 = vld [vmem:[#allocation12 + $0x34] ss:$12 sps:$4 sm:$0xff]   ;;  %v1104_v44 = vld [vmem:[#allocation12 + $0x30] ss:$12 sps:$4 sm:$0xff]   ;;  %v1124_v45 = vld [vmem:[#allocation12 + $0x38] ss:$12 sps:$4 sm:$0xff]   ;;  %v228_v12 = vlaneseq }
  0x7b   :  { %v1109_v46 = vld [vmem:[#allocation12 + $0x4c] ss:$12 sps:$4 sm:$0xff]   ;;  %v1107_v47 = vld [vmem:[#allocation12 + $0x48] ss:$12 sps:$4 sm:$0xff]   ;;  %v1125_v48 = vld [vmem:[#allocation12 + $0x50] ss:$12 sps:$4 sm:$0xff]  }
  0x7c   :  { %986 = vmatpush3.bf16.msra.mxu0 %v1073_v10  ;;  %v1112_v49 = vld [vmem:[#allocation12 + $0x64] ss:$12 sps:$4 sm:$0xff]   ;;  %v1110_v50 = vld [vmem:[#allocation12 + $0x60] ss:$12 sps:$4 sm:$0xff]   ;;  %v1126_v51 = vld [vmem:[#allocation12 + $0x68] ss:$12 sps:$4 sm:$0xff]  }
  0x7d   :  { %987 = vmatprep.subr.bf16.mxu0 %v1346_v0  ;;  %378 = vmatpush1.bf16.msra.mxu1 %v1080_v14  ;;  %v1115_v52 = vld [vmem:[#allocation12 + $0x7c] ss:$12 sps:$4 sm:$0xff]   ;;  %v1113_v53 = vld [vmem:[#allocation12 + $0x78] ss:$12 sps:$4 sm:$0xff]   ;;  %v1127_v54 = vld [vmem:[#allocation12 + $0x80] ss:$12 sps:$4 sm:$0xff]  }
  0x7e   :  { %379 = vmatprep.subr.bf16.mxu1 %v1082_v15  ;;  %v1118_v55 = vld [vmem:[#allocation12 + $0x94] ss:$12 sps:$4 sm:$0xff]   ;;  %v1116_v56 = vld [vmem:[#allocation12 + $0x90] ss:$12 sps:$4 sm:$0xff]   ;;  %v1128_v57 = vld [vmem:[#allocation12 + $0x98] ss:$12 sps:$4 sm:$0xff]  }
  0x7f   :  { %v1122_v58 = vld [vmem:[#allocation12 + $0xac] ss:$12 sps:$4 sm:$0xff]   ;;  %v1120_v59 = vld [vmem:[#allocation12 + $0xa8] ss:$12 sps:$4 sm:$0xff]   ;;  %v1129_v61 = vld [vmem:[#allocation12 + $0xb0] ss:$12 sps:$4 sm:$0xff]  }
  0x80   :  { %988 = vmatpush3.bf16.msra.mxu0 %v1077_v13  ;;  %v1542_v60 = vld [vmem:[#allocation7] sm:$0xff]  ;;  %v1130_v63 = vld [vmem:[#allocation13] sm:$0xff]   ;;  %v1132_v2 = vld [vmem:[#allocation13 + $0x10] sm:$0xff]   ;;  %v229_v13 = vshrl.u32 %v228_v12, 7 }
  0x81   :  { %989 = vmatprep.subr.bf16.mxu0 %v1346_v0  ;;  %380 = vmatpush1.bf16.msra.mxu1 %v1084_v17  ;;  %v469_v62 = vpack.c.bf16 %v1542_v60, %v1542_v60  ;;  %v1131_v1 = vld [vmem:[#allocation13 + $0x8] sm:$0xff]   ;;  %v1133_v3 = vld [vmem:[#allocation13 + $0x18] sm:$0xff]   ;;  %v1134_v4 = vld [vmem:[#allocation13 + $0x20] sm:$0xff]  }
  0x82   :  { %381 = vmatprep.subr.bf16.mxu1 %v1086_v18  ;;  %v1135_v5 = vld [vmem:[#allocation13 + $0x28] sm:$0xff]   ;;  %v1136_v6 = vld [vmem:[#allocation13 + $0x30] sm:$0xff]   ;;  %v1137_v7 = vld [vmem:[#allocation13 + $0x38] sm:$0xff]   ;;  %v230_v14 = vsub.s32 0, %v229_v13 }
  0x83   :  { %v226_v15 = vld [vmem:[%s1596_s5] sm:$0x7] }
  0x84   :  { %990 = vmatpush3.bf16.msra.mxu0 %v1081_v16  ;;  %v234_v16 = vsub.s32 1, %v229_v13  ;;  %v231_v17 = vrot.slane %v226_v15, %v230_v14 }
  0x85   :  { %991 = vmatprep.subr.bf16.mxu0 %v1346_v0  ;;  %382 = vmatpush1.bf16.msra.mxu1 %v1088_v20 }
  0x86   :  { %383 = vmatprep.subr.bf16.mxu1 %v1090_v21 }
  0x88   :  { %992 = vmatpush3.bf16.msra.mxu0 %v1085_v19  ;;  %v235_v19 = vrot.slane %v226_v15, %v234_v16 }
  0x89   :  { %993 = vmatprep.subr.bf16.mxu0 %v1346_v0  ;;  %384 = vmatpush1.bf16.msra.mxu1 %v1092_v23 }
  0x8a   :  { %385 = vmatprep.subr.bf16.mxu1 %v1094_v25 }
  0x8c   :  { %994 = vmatpush3.bf16.msra.mxu0 %v1089_v22 }
  0x8d   :  { %995 = vmatprep.subr.bf16.mxu0 %v1346_v0  ;;  %386 = vmatpush1.bf16.msra.mxu1 %v1096_v26 }
  0x8e   :  { %630 = vmatprep.subr.bf16.mxu1 %v1100_v28 }
  0x90   :  { %996 = vmatpush3.bf16.msra.mxu0 %v1093_v24 }
  0x91   :  { %997 = vmatprep.subr.bf16.mxu0 %v1346_v0 }
  0x94   :  { %998 = vmatpush3.bf16.msra.mxu0 %v1097_v27 }
  0x95   :  { %1003 = vmatprep.subr.bf16.mxu0 %v1346_v0 }
 0x14a   :  { %v186_v31 = vpop.f32.mrb[0].mxu0 }
 0x14b   :  { %v187_v32 = vadd.f32 %v881_v30, %v186_v31  ;;  %v981_v33 = vpop.f32.mrb[1].mxu0 }
 0x14c   :  { %v189_v34 = vpop.f32.mrb[2].mxu0 }
 0x14d   :  { %v192_v35 = vmax.f32 %v187_v32, 0.0  ;;  %v982_v36 = vpop.f32.mrb[3].mxu0  ;;  %v238_v32 = vsub.s32 2, %v229_v13  ;;  %v909_v34 = vld [vmem:[%s1598_s7] ss:$0 sm:$0xff]  ;;  %s1349_s7 = smov [#allocation16]  }
 0x14e   :  { %s865_s13 = sshll.u32 %s1349_s7, 4  ;;  %s866_s13 = int_to_ptr.vmem [resolvable:$true] %s865_s13 }
 0x14f   :  { %v193_v39 = vpack.c.bf16 %v192_v35, %v192_v35  ;;  %v239_v35 = vrot.slane %v226_v15, %v238_v32  ;;  %s1280_s15 = scalar_lea.vmem %s866_s13, 128  ;;  %p1285_p7 = scmp.lt.s32.totalorder %s866_s13, %s866_s13 }
 0x150   :  { %p1281_p6 = scmp.ne.s32.totalorder %s866_s13, %s1280_s15  ;;  %p1286_p8 = scmp.lt.s32.totalorder %s1280_s15, %s1280_s15 }
 0x151   :  { %404 = vmatmul.mubr.bf16.vlgmr.msra.gmra.mrb[0].mxu1 %v193_v39  ;;  %1000 = vmatmul.mubr.bf16.vlgmr.msra.gmra.mrb[4].mxu0 %v193_v39 }
 0x152   :  { %631 = vmatpush1.bf16.msra.mxu1 %v1098_v37  ;;  %1004 = vmatpush3.bf16.msra.mxu0 %v1119_v38  ;;  %p1287_p9 = por %p1286_p8, %p1285_p7 }
 0x153   :  { %632 = vmatprep.subr.bf16.mxu1 %v1103_v40  ;;  %1005 = vmatprep.subr.bf16.mxu0 %v1346_v0 }
 0x154   :  { %662 = vmatprep.mubr.bf16.mxu1 %v1348_v29  ;;  %1019 = vmatprep.mubr.msk.bf16.mxu0 %vm1347_vm0, %v1346_v0  ;;  %p1288_p10 = pnand %p1287_p9, %p1281_p6 }
 0x156   :  { %633 = vmatpush1.bf16.msra.mxu1 %v1101_v41  ;;  %1006 = vmatpush3.bf16.msra.mxu0 %v1123_v42 }
 0x157   :  { %634 = vmatprep.subr.bf16.mxu1 %v1106_v43  ;;  %1007 = vmatprep.subr.bf16.mxu0 %v1346_v0 }
 0x15a   :  { %635 = vmatpush1.bf16.msra.mxu1 %v1104_v44  ;;  %1008 = vmatpush3.bf16.msra.mxu0 %v1124_v45 }
 0x15b   :  { %636 = vmatprep.subr.bf16.mxu1 %v1109_v46  ;;  %1009 = vmatprep.subr.bf16.mxu0 %v1346_v0 }
 0x15e   :  { %637 = vmatpush1.bf16.msra.mxu1 %v1107_v47  ;;  %1010 = vmatpush3.bf16.msra.mxu0 %v1125_v48 }
 0x15f   :  { %638 = vmatprep.subr.bf16.mxu1 %v1112_v49  ;;  %1011 = vmatprep.subr.bf16.mxu0 %v1346_v0 }
 0x162   :  { %639 = vmatpush1.bf16.msra.mxu1 %v1110_v50  ;;  %1012 = vmatpush3.bf16.msra.mxu0 %v1126_v51 }
 0x163   :  { %640 = vmatprep.subr.bf16.mxu1 %v1115_v52  ;;  %1013 = vmatprep.subr.bf16.mxu0 %v1346_v0 }
 0x166   :  { %641 = vmatpush1.bf16.msra.mxu1 %v1113_v53  ;;  %1014 = vmatpush3.bf16.msra.mxu0 %v1127_v54 }
 0x167   :  { %642 = vmatprep.subr.bf16.mxu1 %v1118_v55  ;;  %1015 = vmatprep.subr.bf16.mxu0 %v1346_v0 }
 0x16a   :  { %643 = vmatpush1.bf16.msra.mxu1 %v1116_v56  ;;  %1016 = vmatpush3.bf16.msra.mxu0 %v1128_v57 }
 0x16b   :  { %644 = vmatprep.subr.bf16.mxu1 %v1122_v58  ;;  %1017 = vmatprep.subr.bf16.mxu0 %v1346_v0 }
 0x16e   :  { %645 = vmatpush1.bf16.msra.mxu1 %v1120_v59  ;;  %1018 = vmatpush3.bf16.msra.mxu0 %v1129_v61 }
 0x16f   :  { %1023 = vmatprep.subr.bf16.mxu1 %v1346_v0 }
 0x171   :  { %663 = vmatmul.mubr.bf16.vlgmr.msra.gmra.mrb[0].mxu1 %v469_v62  ;;  %1020 = vmatmul.mubr.bf16.vlgmr.msra.gmra.mrb[8].mxu0 %v469_v62 }
 0x172   :  { %1039 = vmatprep.mubr.msk.bf16.mxu1 %vm1347_vm0, %v1346_v0  ;;  %1024 = vmatpush3.bf16.msra.mxu1 %v1130_v63 }
 0x173   :  { %1025 = vmatprep.subr.bf16.mxu1 %v1346_v0 }
 0x176   :  { %1026 = vmatpush3.bf16.msra.mxu1 %v1131_v1 }
 0x177   :  { %1027 = vmatprep.subr.bf16.mxu1 %v1346_v0 }
 0x17a   :  { %1028 = vmatpush3.bf16.msra.mxu1 %v1132_v2 }
 0x17b   :  { %1029 = vmatprep.subr.bf16.mxu1 %v1346_v0 }
 0x17e   :  { %1030 = vmatpush3.bf16.msra.mxu1 %v1133_v3 }
 0x17f   :  { %1031 = vmatprep.subr.bf16.mxu1 %v1346_v0 }
 0x182   :  { %1032 = vmatpush3.bf16.msra.mxu1 %v1134_v4 }
 0x183   :  { %1033 = vmatprep.subr.bf16.mxu1 %v1346_v0 }
 0x186   :  { %1034 = vmatpush3.bf16.msra.mxu1 %v1135_v5 }
 0x187   :  { %1035 = vmatprep.subr.bf16.mxu1 %v1346_v0 }
 0x18a   :  { %1036 = vmatpush3.bf16.msra.mxu1 %v1136_v6 }
 0x18b   :  { %1037 = vmatprep.subr.bf16.mxu1 %v1346_v0 }
 0x18e   :  { %1038 = vmatpush3.bf16.msra.mxu1 %v1137_v7 }
 0x224   :  { %v446_v8 = vpop.f32.mrb[4].mxu0 }
 0x225   :  { %v1001_v9 = vpop.f32.mrb[5].mxu0  ;;  %v447_v39 = vadd.f32 %v446_v8, %v239_v35 }
 0x226   :  { %v449_v10 = vpop.f32.mrb[6].mxu0 }
 0x227   :  { %v1002_v11 = vpop.f32.mrb[7].mxu0 }
 0x244   :  { %v664_v18 = vpop.f32.mrb[0].mxu1  ;;  %v705_v20 = vpop.f32.mrb[8].mxu0 }
 0x245   :  { %v1043_v21 = vadd.f32 %v664_v18, %v231_v17  ;;  %v666_v22 = vpop.f32.mrb[1].mxu1  ;;  %v1021_v0 = vpop.f32.mrb[9].mxu0  ;;  %v725_v37 = vadd.f32 %v909_v34, %v705_v20 }
 0x246   :  { %v668_v23 = vpop.f32.mrb[2].mxu1  ;;  %v708_v24 = vpop.f32.mrb[10].mxu0  ;;  %v1044_v28 = vadd.f32 %v666_v22, %v235_v19 }
 0x247   :  { %v934_v25 = vmul.f32 -1.442695, %v1043_v21  ;;  %v669_v26 = vpop.f32.mrb[3].mxu1  ;;  %v1022_v27 = vpop.f32.mrb[11].mxu0 }
 0x248   :  { %v935_v29 = vmul.f32 -1.442695, %v1044_v28 }
 0x249   :  { %1138 = vpow2.f32 %v934_v25 }
 0x24a   :  { %1140 = vpow2.f32 %v935_v29 }
 0x253   :  { %v1139_v30 = vpop.eup %1138 }
 0x254   :  { %v719_v31 = vadd.f32 1.0, %v1139_v30  ;;  %v1141_v33 = vpop.eup %1140 }
 0x255   :  { %v720_v36 = vadd.f32 1.0, %v1141_v33 }
 0x256   :  { %1142 = vrcp.f32 %v719_v31 }
 0x257   :  { %1144 = vrcp.f32 %v720_v36 }
 0x260   :  { %v1143_v38 = vpop.eup %1142 }
 0x261   :  { %v726_v40 = vmul.f32 %v1143_v38, %v725_v37  ;;  %v1145_v42 = vpop.eup %1144 }
 0x262   :  { %v729_v43 = vsub.f32 1.0, %v1145_v42  ;;  %v731_v46 = vmul.f32 %v1145_v42, %v1542_v60 }
 0x263   :  { %v727_v41 = vadd.f32 %v726_v40, %v447_v39 }
 0x265   :  { %1146 = vtanh.f32 %v727_v41 }
 0x26f   :  { %v1147_v44 = vpop.eup %1146 }
 0x270   :  { %v730_v45 = vmul.f32 %v1147_v44, %v729_v43 }
 0x272   :  { %v732_v47 = vadd.f32 %v731_v46, %v730_v45 }
 0x274   :  { %v736_v48 = vpack.c.bf16 %v732_v47, %v732_v47  ;;  %734 = vst [vmem:[#allocation16] sm:$0xff] %v732_v47 }
 0x276   :  { %1040 = vmatmul.mubr.bf16.vlgmr.msra.gmra.mrb[4].mxu1 %v736_v48 }
 0x277   :  { %1291 = shalt.err (!%p1288_p10)
}
 0x278   :  { %s1292_s17 = scalar_lea.hbm %s1602_s11, 128 }
 0x279   :  { %p1293_p11 = scmp.ne.s32.totalorder %s1602_s11, %s1292_s17  ;;  %p1296_p12 = scmp.lt.u32.totalorder %s1292_s17, %s1602_s11 }
 0x27b   :  { %p1298_p13 = pnand %p1296_p12, %p1293_p11 }
 0x27d   :  { %1301 = shalt.err (!%p1298_p13)
}
 0x27e   :  { %868 = dma.vmem_to_hbm [thread:$0]  %s866_s13, 128, %s1602_s11, [#allocation17]   ;;  %v936_v49 = vld [vmem:[%s1600_s9] ss:$0 sm:$0xff] }
 0x27f   :  { %s1350_s28 = smov [#allocation15]  }
 0x280   :  { %s855_s29 = sshll.u32 %s1350_s28, 4  ;;  %s856_s29 = int_to_ptr.vmem [resolvable:$true] %s855_s29 }
 0x281   :  { %s1302_s30 = scalar_lea.vmem %s856_s29, 128  ;;  %p1307_p1 = scmp.lt.s32.totalorder %s856_s29, %s856_s29 }
 0x282   :  { %p1303_p0 = scmp.ne.s32.totalorder %s856_s29, %s1302_s30  ;;  %p1308_p2 = scmp.lt.s32.totalorder %s1302_s30, %s1302_s30 }
 0x284   :  { %p1309_p3 = por %p1308_p2, %p1307_p1 }
 0x286   :  { %p1310_p4 = pnand %p1309_p3, %p1303_p0 }
 0x349   :  { %v842_v50 = vpop.f32.mrb[4].mxu1 }
 0x34a   :  { %v843_v51 = vadd.f32 %v936_v49, %v842_v50  ;;  %v1041_v52 = vpop.f32.mrb[5].mxu1 }
 0x34b   :  { %v845_v53 = vpop.f32.mrb[6].mxu1 }
 0x34c   :  { %848 = vst [vmem:[#allocation15] sm:$0xff] %v843_v51  ;;  %v1042_v54 = vpop.f32.mrb[7].mxu1 }
 0x34d   :  { %1313 = shalt.err (!%p1310_p4)
}
 0x34e   :  { %s1314_s9 = scalar_lea.hbm %s1601_s10, 128 }
 0x34f   :  { %p1315_p5 = scmp.ne.s32.totalorder %s1601_s10, %s1314_s9  ;;  %p1318_p6 = scmp.lt.u32.totalorder %s1314_s9, %s1601_s10 }
 0x351   :  { %p1320_p7 = pnand %p1318_p6, %p1315_p5 }
 0x353   :  { %1323 = shalt.err (!%p1320_p7)
}
 0x354   :  { %858 = dma.vmem_to_hbm [thread:$0]  %s856_s29, 128, %s1601_s10, [#allocation6]  }
 0x355   :  { %1332 = dma.done.wait [#allocation6], 128  }
 0x356   :  { %1333 = vsyncadd [#allocation6], 4294967168 }
 0x357   :  { %1334 = dma.done.wait [#allocation17], 128  }
 0x358   :  { %1335 = vsyncadd [#allocation17], 4294967168 }
 0x359   :  { %875 = vsyncpa [#allocation5], 1 }
 0x35a   :  { %876 = vsyncpa [#allocation8], 1 }
 0x35b   :  { %877 = vsyncpa [#allocation11], 1 }
 0x35c   :  { %878 = vsyncpa [#allocation14], 1 }
 0x35d   :  { %879 = vsyncpa [#allocation6], 1 }
 0x35e   :  { %880 = vsyncpa [#allocation17], 1 }

</bundles_post_ra>
